<compile_context>
chip_gen: v6e
topology: v6e:2x2x1
jax: 0.10.0
libtpu: 0.0.40
codegen_flags: <defaults>
</compile_context>

<pallas_src>
import functools

import jax
import jax.numpy as jnp
from jax import lax
from jax.experimental import pallas as pl
from jax.experimental.pallas import tpu as pltpu

_LANES = 128


def _dice_kernel(pred_ref, targ_ref, out_ref, acc_int_ref, acc_sum_ref, *,
                 smooth, rows, block_rows, needs_mask):
    """Grid reduction over (block_rows, 128) tiles.

    Accumulates elementwise pred*target and pred+target into full-tile VMEM
    accumulators (VPU-only hot loop); the cross-lane reduction and the scalar
    dice-loss computation happen once on the final grid step.
    """
    i = pl.program_id(0)

    @pl.when(i == 0)
    def _():
        acc_int_ref[...] = jnp.zeros_like(acc_int_ref)
        acc_sum_ref[...] = jnp.zeros_like(acc_sum_ref)

    p = pred_ref[...].astype(jnp.float32)
    t = targ_ref[...].astype(jnp.float32)

    if needs_mask:
        # Last block extends past `rows`; Pallas pads the edge block with
        # unspecified values, so mask them out (static gate: only traced when
        # rows % block_rows != 0).
        row_ids = lax.broadcasted_iota(jnp.int32, (block_rows, _LANES), 0)
        valid = (row_ids + i * block_rows) < rows
        p = jnp.where(valid, p, 0.0)
        t = jnp.where(valid, t, 0.0)

    acc_int_ref[...] += p * t        # intersection partial sums (per lane)
    acc_sum_ref[...] += p + t        # sum(pred) + sum(target), folded

    @pl.when(i == pl.num_programs(0) - 1)
    def _():
        inter = jnp.sum(acc_int_ref[...])
        denom = jnp.sum(acc_sum_ref[...])
        dice_coeff = (2.0 * inter + smooth) / (denom + smooth)
        out_ref[0, 0] = 1.0 - dice_coeff


def dice_loss_pallas(pred, target, smooth=1.0, block_rows=2048):
    """Pallas implementation of DiceLoss.forward.

    pred:   [B, 1, H, W] or [B, 2, H, W]  (channel 1 selected if C == 2)
    target: [B, 1, H, W]
    returns: scalar float32 dice loss
    """
    assert block_rows % 8 == 0, "block_rows must be a multiple of 8"

    if pred.shape[1] == 2:
        # Channel select; this slice does copy, but only in the 2-channel case.
        pred = pred[:, 1, :, :]

    p = pred.reshape(-1)      # free contiguous reshape (no HBM copy)
    t = target.reshape(-1)
    n = p.shape[0]

    # Pad (copy) only in the rare case the flat length is not lane-aligned.
    if n % _LANES != 0:
        pad = _LANES - (n % _LANES)
        p = jnp.pad(p, (0, pad))
        t = jnp.pad(t, (0, pad))
        n = n + pad

    rows = n // _LANES
    p = p.reshape(rows, _LANES)   # free contiguous reshape
    t = t.reshape(rows, _LANES)

    if rows <= block_rows:
        br = rows                 # single block equal to the full dim (legal)
        n_blocks = 1
    else:
        br = block_rows
        n_blocks = pl.cdiv(rows, br)

    needs_mask = (rows % br) != 0

    kernel = functools.partial(
        _dice_kernel,
        smooth=float(smooth),
        rows=rows,
        block_rows=br,
        needs_mask=needs_mask,
    )

    out = pl.pallas_call(
        kernel,
        out_shape=jax.ShapeDtypeStruct((1, 1), jnp.float32),
        grid_spec=pltpu.PrefetchScalarGridSpec(
            num_scalar_prefetch=0,
            grid=(n_blocks,),
            in_specs=[
                pl.BlockSpec((br, _LANES), lambda i: (i, 0)),
                pl.BlockSpec((br, _LANES), lambda i: (i, 0)),
            ],
            out_specs=pl.BlockSpec(memory_space=pltpu.SMEM),
            scratch_shapes=[
                pltpu.VMEM((br, _LANES), jnp.float32),   # acc: pred*target
                pltpu.VMEM((br, _LANES), jnp.float32),   # acc: pred+target
            ],
        ),
        compiler_params=pltpu.CompilerParams(
            dimension_semantics=("arbitrary",),   # sequential reduction axis
        ),
    )(p, t)

    return out[0, 0]


def _dice_ref(pred, target, smooth=1.0):
    """Pure-JAX reference (same math as the PyTorch module)."""
    if pred.shape[1] == 2:
        pred = pred[:, 1, :, :]
    p = pred.reshape(-1).astype(jnp.float32)
    t = target.reshape(-1).astype(jnp.float32)
    inter = jnp.sum(p * t)
    return 1.0 - (2.0 * inter + smooth) / (jnp.sum(p) + jnp.sum(t) + smooth)


if __name__ == "__main__":
    key = jax.random.PRNGKey(0)
    k1, k2, k3, k4, k5, k6 = jax.random.split(key, 6)

    # --- Primary case: [B, 1, H, W] predictions / targets -------------------
    B, C, H, W = 2, 1, 16, 16
    pred = jax.nn.sigmoid(jax.random.normal(k1, (B, C, H, W), dtype=jnp.float32))
    target = (jax.random.uniform(k2, (B, C, H, W)) > 0.5).astype(jnp.float32)

    loss = dice_loss_pallas(pred, target, smooth=1.0)
    loss = jax.block_until_ready(loss)
    ref = _dice_ref(pred, target, smooth=1.0)
    assert jnp.allclose(loss, ref, atol=1e-5, rtol=1e-5), (loss, ref)

    # --- 2-channel prediction path (channel 1 selected) ---------------------
    pred2 = jax.nn.sigmoid(jax.random.normal(k3, (B, 2, H, W), dtype=jnp.float32))
    target2 = (jax.random.uniform(k4, (B, 1, H, W)) > 0.5).astype(jnp.float32)
    loss2 = jax.block_until_ready(dice_loss_pallas(pred2, target2, smooth=1.0))
    ref2 = _dice_ref(pred2, target2, smooth=1.0)
    assert jnp.allclose(loss2, ref2, atol=1e-5, rtol=1e-5), (loss2, ref2)

    # --- Multi-block + ragged-tail (masked) path, with a tiny block size ----
    pred3 = jax.nn.sigmoid(jax.random.normal(k5, (2, 1, 40, 40), dtype=jnp.float32))
    target3 = (jax.random.uniform(k6, (2, 1, 40, 40)) > 0.5).astype(jnp.float32)
    loss3 = jax.block_until_ready(dice_loss_pallas(pred3, target3, smooth=1.0,
                                                   block_rows=8))
    ref3 = _dice_ref(pred3, target3, smooth=1.0)
    assert jnp.allclose(loss3, ref3, atol=1e-5, rtol=1e-5), (loss3, ref3)

    print("KERNEL_OK")
</pallas_src>

<mosaic_0001>
module attributes {stable_mosaic.version = 11 : i64} {
  func.func @_dice_kernel(%arg0: i32, %arg1: memref<4x128xf32, #tpu.memory_space<vmem>>, %arg2: memref<4x128xf32, #tpu.memory_space<vmem>>, %arg3: memref<1x1xf32, #tpu.memory_space<smem>>, %arg4: memref<4x128xf32, #tpu.memory_space<vmem>>, %arg5: memref<4x128xf32, #tpu.memory_space<vmem>>) attributes {dimension_semantics = [#tpu.dimension_semantics<arbitrary>], iteration_bounds = array<i64: 1>, scalar_prefetch = 0 : i64, scratch_operands = 2 : i64, tpu.core_type = #tpu.core_type<tc>, window_params = [{transform_indices = @transform_0, window_bounds = array<i64: 4, 128>}, {transform_indices = @transform_1, window_bounds = array<i64: 4, 128>}, {transform_indices = @transform_2, window_bounds = array<i64: 1, 1>}]} {
    %c0_i32 = arith.constant 0 : i32
    %0 = arith.cmpi eq, %arg0, %c0_i32 : i32
    %1 = arith.extui %0 : i1 to i32
    %c0_i32_0 = arith.constant 0 : i32
    %2 = arith.cmpi ne, %1, %c0_i32_0 : i32
    scf.if %2 {
      %cst = arith.constant 0.000000e+00 : f32
      %16 = vector.broadcast %cst : f32 to vector<4x128xf32>
      %c0_14 = arith.constant 0 : index
      %c0_15 = arith.constant 0 : index
      %17 = vector.load %arg4[%c0_14, %c0_15] : memref<4x128xf32, #tpu.memory_space<vmem>>, vector<4x128xf32>
      tpu.vector_store %arg4[%c0_14, %c0_15], %16 {strides = array<i32>} : memref<4x128xf32, #tpu.memory_space<vmem>>, vector<4x128xf32>,
      %cst_16 = arith.constant 0.000000e+00 : f32
      %18 = vector.broadcast %cst_16 : f32 to vector<4x128xf32>
      %c0_17 = arith.constant 0 : index
      %c0_18 = arith.constant 0 : index
      %19 = vector.load %arg5[%c0_17, %c0_18] : memref<4x128xf32, #tpu.memory_space<vmem>>, vector<4x128xf32>
      tpu.vector_store %arg5[%c0_17, %c0_18], %18 {strides = array<i32>} : memref<4x128xf32, #tpu.memory_space<vmem>>, vector<4x128xf32>,
    } else {
    }
    %c0 = arith.constant 0 : index
    %c0_1 = arith.constant 0 : index
    %3 = vector.load %arg1[%c0, %c0_1] : memref<4x128xf32, #tpu.memory_space<vmem>>, vector<4x128xf32>
    %c0_2 = arith.constant 0 : index
    %c0_3 = arith.constant 0 : index
    %4 = vector.load %arg2[%c0_2, %c0_3] : memref<4x128xf32, #tpu.memory_space<vmem>>, vector<4x128xf32>
    %c0_4 = arith.constant 0 : index
    %c0_5 = arith.constant 0 : index
    %5 = vector.load %arg4[%c0_4, %c0_5] : memref<4x128xf32, #tpu.memory_space<vmem>>, vector<4x128xf32>
    %6 = arith.mulf %3, %4 : vector<4x128xf32>
    %7 = arith.addf %5, %6 : vector<4x128xf32>
    %c0_6 = arith.constant 0 : index
    %c0_7 = arith.constant 0 : index
    %8 = vector.load %arg4[%c0_6, %c0_7] : memref<4x128xf32, #tpu.memory_space<vmem>>, vector<4x128xf32>
    tpu.vector_store %arg4[%c0_6, %c0_7], %7 {strides = array<i32>} : memref<4x128xf32, #tpu.memory_space<vmem>>, vector<4x128xf32>,
    %c0_8 = arith.constant 0 : index
    %c0_9 = arith.constant 0 : index
    %9 = vector.load %arg5[%c0_8, %c0_9] : memref<4x128xf32, #tpu.memory_space<vmem>>, vector<4x128xf32>
    %10 = arith.addf %3, %4 : vector<4x128xf32>
    %11 = arith.addf %9, %10 : vector<4x128xf32>
    %c0_10 = arith.constant 0 : index
    %c0_11 = arith.constant 0 : index
    %12 = vector.load %arg5[%c0_10, %c0_11] : memref<4x128xf32, #tpu.memory_space<vmem>>, vector<4x128xf32>
    tpu.vector_store %arg5[%c0_10, %c0_11], %11 {strides = array<i32>} : memref<4x128xf32, #tpu.memory_space<vmem>>, vector<4x128xf32>,
    %c0_i32_12 = arith.constant 0 : i32
    %13 = arith.cmpi eq, %arg0, %c0_i32_12 : i32
    %14 = arith.extui %13 : i1 to i32
    %c0_i32_13 = arith.constant 0 : i32
    %15 = arith.cmpi ne, %14, %c0_i32_13 : i32
    scf.if %15 {
      %c0_14 = arith.constant 0 : index
      %c0_15 = arith.constant 0 : index
      %16 = vector.load %arg4[%c0_14, %c0_15] : memref<4x128xf32, #tpu.memory_space<vmem>>, vector<4x128xf32>
      %17 = vector.shape_cast %16 : vector<4x128xf32> to vector<1x4x128xf32>
      %cst = arith.constant dense<0.000000e+00> : vector<1xf32>
      %18 = vector.multi_reduction <add>, %17, %cst [1, 2] : vector<1x4x128xf32> to vector<1xf32>
      %19 = vector.shape_cast %18 : vector<1xf32> to vector<1x1x1xf32>
      %20 = vector.extract %19[0, 0, 0] : f32 from vector<1x1x1xf32>
      %c0_16 = arith.constant 0 : index
      %c0_17 = arith.constant 0 : index
      %21 = vector.load %arg5[%c0_16, %c0_17] : memref<4x128xf32, #tpu.memory_space<vmem>>, vector<4x128xf32>
      %22 = vector.shape_cast %21 : vector<4x128xf32> to vector<1x4x128xf32>
      %cst_18 = arith.constant dense<0.000000e+00> : vector<1xf32>
      %23 = vector.multi_reduction <add>, %22, %cst_18 [1, 2] : vector<1x4x128xf32> to vector<1xf32>
      %24 = vector.shape_cast %23 : vector<1xf32> to vector<1x1x1xf32>
      %25 = vector.extract %24[0, 0, 0] : f32 from vector<1x1x1xf32>
      %cst_19 = arith.constant 2.000000e+00 : f32
      %26 = arith.mulf %cst_19, %20 : f32
      %cst_20 = arith.constant 1.000000e+00 : f32
      %27 = arith.addf %26, %cst_20 : f32
      %cst_21 = arith.constant 1.000000e+00 : f32
      %28 = arith.addf %25, %cst_21 : f32
      %29 = arith.divf %27, %28 : f32
      %cst_22 = arith.constant 1.000000e+00 : f32
      %30 = arith.subf %cst_22, %29 : f32
      %c0_23 = arith.constant 0 : index
      %c0_24 = arith.constant 0 : index
      %31 = memref.load %arg3[%c0_23, %c0_24] : memref<1x1xf32, #tpu.memory_space<smem>>
      memref.store %30, %arg3[%c0_23, %c0_24] : memref<1x1xf32, #tpu.memory_space<smem>>
    } else {
    }
    return
  }
  func.func @transform_0(%arg0: i32) -> (i32, i32) {
    %c0_i32 = arith.constant 0 : i32
    %c0_i32_0 = arith.constant 0 : i32
    return %arg0, %c0_i32 : i32, i32
  }
  func.func @transform_1(%arg0: i32) -> (i32, i32) {
    %c0_i32 = arith.constant 0 : i32
    %c0_i32_0 = arith.constant 0 : i32
    return %arg0, %c0_i32 : i32, i32
  }
  func.func @transform_2(%arg0: i32) -> (i32, i32) {
    %c0_i32 = arith.constant 0 : i32
    %c0_i32_0 = arith.constant 0 : i32
    %c0_i32_1 = arith.constant 0 : i32
    return %c0_i32, %c0_i32_0 : i32, i32
  }
}

</mosaic_0001>

<bundles_post_ra>
// kernel: tpu_custom_call.1
= control target key start
LH: loop header
LB: loop body
LE: loop exit
PB: predicated region body
PF: predicated region fallthrough
CT: control target
= control target key end

     0   :  { %7 = vsyncpa [#allocation5], 0  ;;  %s197_s0 = inlined_call_operand.hbm [shape: f32[4,128], index: 0, kind: input, shape index: {}]   ;;  %s198_s1 = inlined_call_operand.hbm [shape: f32[4,128], index: 1, kind: input, shape index: {}]   ;;  %s199_s2 = inlined_call_operand.hbm [shape: f32[1,1], index: 2, kind: output, shape index: {}]  }
   0x1   :  { %8 = vsyncpa [#allocation8], 0 }
   0x2   :  { %9 = vsyncpa [#allocation6], 0  ;;  %s169_s9 = smov [#allocation4]   ;;  %s170_s11 = smov [#allocation7]  }
   0x3   :  { %s16_s10 = sshll.u32 %s169_s9, 4  ;;  %s26_s12 = sshll.u32 %s170_s11, 4  ;;  %s17_s10 = int_to_ptr.vmem [resolvable:$true] %s16_s10  ;;  %s27_s12 = int_to_ptr.vmem [resolvable:$true] %s26_s12 }
   0x4   :  { %s123_s13 = scalar_lea.vmem %s17_s10, 64  ;;  %p128_p1 = scmp.lt.s32.totalorder %s17_s10, %s17_s10 }
   0x5   :  { %p124_p0 = scmp.ne.s32.totalorder %s17_s10, %s123_s13  ;;  %p129_p2 = scmp.lt.s32.totalorder %s123_s13, %s123_s13 }
   0x7   :  { %p130_p3 = por %p129_p2, %p128_p1 }
   0x9   :  { %p131_p4 = pnand %p130_p3, %p124_p0 }
   0xb   :  { %134 = shalt.err (!%p131_p4)
}
   0xc   :  { %19 = dma.hbm_to_vmem [thread:$0]  %s197_s0, 64, %s17_s10, [#allocation5]  }
   0xd   :  { %s143_s16 = scalar_lea.vmem %s27_s12, 64  ;;  %p148_p6 = scmp.lt.s32.totalorder %s27_s12, %s27_s12 }
   0xe   :  { %p144_p5 = scmp.ne.s32.totalorder %s27_s12, %s143_s16  ;;  %p149_p7 = scmp.lt.s32.totalorder %s143_s16, %s143_s16 }
  0x10   :  { %p150_p8 = por %p149_p7, %p148_p6 }
  0x12   :  { %p151_p9 = pnand %p150_p8, %p144_p5 }
  0x14   :  { %154 = shalt.err (!%p151_p9)
}
  0x15   :  { %29 = dma.hbm_to_vmem [thread:$0]  %s198_s1, 64, %s27_s12, [#allocation8]  }
  0x16   :  { %163 = dma.done.wait [#allocation5], 64  }
  0x17   :  { %164 = vsyncadd [#allocation5], 4294967232 }
  0x18   :  { %165 = dma.done.wait [#allocation8], 64  }
  0x19   :  { %166 = vsyncadd [#allocation8], 4294967232  ;;  %v171_v0 = vmov 0.0   ;;  %v42_v1 = vld [vmem:[#allocation4] sm:$0xf]  ;;  %vm56_vm0 = vcmask 1043456  }
  0x1a   :  { %40 = vst [vmem:[#allocation2] sm:$0xf] %v171_v0  ;;  %41 = vst [vmem:[#allocation3] sm:$0xf] %v171_v0  ;;  %v43_v2 = vld [vmem:[#allocation7] sm:$0xf] }
  0x1b   :  { %v45_v4 = vmul.f32 %v43_v2, %v42_v1  ;;  %v49_v6 = vadd.f32 %v43_v2, %v42_v1  ;;  %s172_s25 = smov [#allocation9]  }
  0x21   :  { %v44_v3 = vld [vmem:[#allocation2] sm:$0xf]  ;;  %v48_v5 = vld [vmem:[#allocation3] sm:$0xf] }
  0x22   :  { %v46_v7 = vadd.f32 %v45_v4, %v44_v3  ;;  %v50_v8 = vadd.f32 %v49_v6, %v48_v5 }
  0x24   :  { %47 = vst [vmem:[#allocation2] sm:$0xf] %v46_v7  ;;  %51 = vst [vmem:[#allocation3] sm:$0xf] %v50_v8 }
  0x2b   :  { %v55_v9 = vld [vmem:[#allocation2] sm:$0xf]  ;;  %v67_v10 = vld [vmem:[#allocation3] sm:$0xf] }
  0x2c   :  { %v57_v11 = vsel %vm56_vm0, %v55_v9, 0.0  ;;  %v68_v12 = vsel %vm56_vm0, %v67_v10, 0.0 }
  0x2d   :  { %58 = vadd.xlane.f32.xlu0 %v57_v11 }
  0x31   :  { %69 = vadd.xlane.f32.xlu0 %v68_v12 }
  0xb6   :  { %v59_v13 = vpop.xlane.xlu0 %58 }
  0xb7   :  { %v60_v14 = vrot.slane %v59_v13, 4 }
  0xb9   :  { %v61_v15 = vadd.f32 %v60_v14, %v59_v13 }
  0xba   :  { %v70_v16 = vpop.xlane.xlu0 %69 }
  0xbb   :  { %v62_v17 = vrot.slane %v61_v15, 2  ;;  %v71_v18 = vrot.slane %v70_v16, 4 }
  0xbd   :  { %v72_v19 = vadd.f32 %v71_v18, %v70_v16  ;;  %v63_v20 = vadd.f32 %v62_v17, %v61_v15 }
  0xbf   :  { %v73_v21 = vrot.slane %v72_v19, 2  ;;  %v64_v22 = vrot.slane %v63_v20, 1 }
  0xc1   :  { %v74_v23 = vadd.f32 %v73_v21, %v72_v19  ;;  %v65_v24 = vadd.f32 %v64_v22, %v63_v20 }
  0xc3   :  { %103 = vpush %v65_v24  ;;  %v75_v25 = vrot.slane %v74_v23, 1 }
  0xc5   :  { %v76_v26 = vadd.f32 %v75_v25, %v74_v23 }
  0xc7   :  { %105 = vpush %v76_v26 }
  0xf4   :  { %s104_s0 = spop %103 }
  0xf5   :  { %s78_s20 = smul.f32 2.0, %s104_s0 }
  0xf7   :  { %s79_s21 = sadd.f32 1.0, %s78_s20 }
  0xf8   :  { %s106_s1 = spop %105 }
  0xf9   :  { %s80_s19 = sadd.f32 1.0, %s106_s1 }
  0xfb   :  { %v81_v27 = vstv %s80_s19 }
  0xfc   :  { %113 = vrcp.f32 %v81_v27 }
 0x109   :  { %v114_v28 = vpop.eup %113 }
 0x10a   :  { %107 = vpush %v114_v28 }
 0x13b   :  { %s108_s22 = spop %107 }
 0x13c   :  { %s84_s23 = smul.f32 %s108_s22, %s79_s21 }
 0x13e   :  { %s85_s24 = ssub.f32 1.0, %s84_s23 }
 0x140   :  { %87 = sst [smem:[#allocation9]] %s85_s24 }
 0x141   :  { %95 = dma.smem_to_hbm %s172_s25, 16, %s199_s2, [#allocation6]  }
 0x142   :  { %167 = dma.done.wait [#allocation6], 16  }
 0x143   :  { %168 = vsyncadd [#allocation6], 4294967280 }
 0x144   :  { %99 = sfence }
 0x145   :  { %100 = vsyncpa [#allocation5], 1 }
 0x146   :  { %101 = vsyncpa [#allocation8], 1 }
 0x147   :  { %102 = vsyncpa [#allocation6], 1 }

</bundles_post_ra>
